<compile_context>
chip_gen: v7x
topology: tpu7x:2x2x1
jax: 0.10.0
libtpu: 0.0.40
codegen_flags: <defaults>
</compile_context>

<pallas_src>
import functools

import numpy as np
import jax
import jax.numpy as jnp
from jax import lax
from jax.experimental import pallas as pl
from jax.experimental.pallas import tpu as pltpu


# ---------------- small config consistent with ABCAttention defaults ----------------
HIDDEN = 32
NUM_HEADS = 2
EXPAND_K = 0.5
EXPAND_V = 1.0
KEY_DIM = int(HIDDEN * EXPAND_K)        # 16
VALUE_DIM = int(HIDDEN * EXPAND_V)      # 32
HEAD_K = KEY_DIM // NUM_HEADS           # 8
HEAD_V = VALUE_DIM // NUM_HEADS         # 16
NUM_SLOTS = HEAD_K                      # 8  (num_slots=None -> head_k_dim)
CLAMP_MIN, CLAMP_MAX = -32.0, 32.0
NORM_EPS = 1e-5
B, T = 2, 8

# 2-D dot_general dimension numbers
NN = (((1,), (0,)), ((), ()))   # standard
NT = (((1,), (1,)), ((), ()))   # rhs transposed
TN = (((0,), (0,)), ((), ()))   # lhs transposed


# ----------------------------- fused Pallas kernel ----------------------------------
def _abc_kernel(x_ref, wf_ref, wot_ref, o_ref, *,
                t, h, dk, dv, m, eps, clamp_min, clamp_max):
    """One batch element per grid step: fused proj -> ABC recurrence -> gated RMSNorm -> o_proj."""
    x = x_ref[...]          # (T, D)        f32
    wf = wf_ref[...]        # (F, D)        F = h*(2dk+2dv+m) = 112; q rows pre-scaled
    wot = wot_ref[...]      # (h*dv, D)     Wo^T with g_norm weight folded in

    # Transposed fused projection (single MXU op).  Fields/heads land on the sublane
    # axis, so every per-head slice below is an aligned sublane slice (free).
    proj = lax.dot_general(wf, x, NT, preferred_element_type=jnp.float32)   # (F, T)

    q_off = 0
    k_off = h * dk
    v_off = 2 * h * dk
    g_off = 2 * h * dk + h * dv
    s_off = 2 * h * dk + 2 * h * dv

    # single causal mask: triu[t_prev, t] = (t_prev <= t)  (time' is the sublane axis
    # of qkT / wT in the transposed orientation)
    r = lax.broadcasted_iota(jnp.int32, (t, t), 0)
    c = lax.broadcasted_iota(jnp.int32, (t, t), 1)
    triu = (r <= c).astype(jnp.float32)

    acc = None
    for hi in range(h):     # only the heads are unrolled (batch is a parallel grid axis)
        qh = proj[q_off + hi * dk:q_off + (hi + 1) * dk, :]           # (dk, T)
        kh = proj[k_off + hi * dk:k_off + (hi + 1) * dk, :]           # (dk, T)
        vh = proj[v_off + hi * dv:v_off + (hi + 1) * dv, :]           # (dv, T)
        gh = proj[g_off + hi * dv:g_off + (hi + 1) * dv, :]           # (dv, T)
        sh = jnp.clip(proj[s_off + hi * m:s_off + (hi + 1) * m, :],
                      clamp_min, clamp_max)                           # (m, T)

        # Per-slot stabilization (max over time) shared by numerator & denominator;
        # exact because it cancels and s is clamped to [-32, 32].
        e = jnp.exp(sh - jnp.max(sh, axis=1, keepdims=True))          # (m, T)
        z = jnp.dot(e, triu, preferred_element_type=jnp.float32)      # causal cumsums (m, T)
        rz = pl.reciprocal(z, approx=True)

        # qkT[t', t] = k_{t'} . q_t  (scale folded into q), masked causally
        qkT = lax.dot_general(kh, qh, TN, preferred_element_type=jnp.float32) * triu
        ok = jnp.dot(e, qkT, preferred_element_type=jnp.float32) * rz  # (m, T)

        # softmax over slots (sublane axis)
        ok = ok - jnp.max(ok, axis=0, keepdims=True)
        p = jnp.exp(ok)
        p = p * pl.reciprocal(jnp.sum(p, axis=0, keepdims=True), approx=True)

        # wT[t', t] = sum_m e[m, t'] * (p*rz)[m, t], masked causally
        wT = lax.dot_general(e, p * rz, TN, preferred_element_type=jnp.float32) * triu
        oh = jnp.dot(vh, wT, preferred_element_type=jnp.float32)       # (dv, T)

        # FusedRMSNormSwishGate (per-channel norm weight folded into wot rows)
        var = jnp.mean(oh * oh, axis=0, keepdims=True)                 # (1, T)
        on = oh * lax.rsqrt(var + eps)
        gate = gh * pl.reciprocal(1.0 + jnp.exp(-gh), approx=True)     # g * sigmoid(g)
        og = on * gate                                                 # (dv, T)

        # Per-head contribution to the output projection -> f32 accumulator (no concats)
        contrib = lax.dot_general(og, wot[hi * dv:(hi + 1) * dv, :], TN,
                                  preferred_element_type=jnp.float32)  # (T, D)
        acc = contrib if acc is None else acc + contrib

    o_ref[...] = acc.astype(o_ref.dtype)
    # TODO(synk): at real sizes present the output lane-dense (hidden padded/aligned to
    # 128 or reshaped to a (*, 128) slab) to avoid masked partial stores; D=32 here is
    # the full hidden dim of the toy config.


# ----------------------------- forward wrapper ---------------------------------------
def abc_attention_forward(x, params, *, num_heads):
    b, t, d = x.shape
    h = num_heads
    dk = params['Wq'].shape[0] // h
    dv = params['Wv'].shape[0] // h
    m = params['Ws'].shape[0] // h

    # Fuse the five projection weights into one (F, D) matrix; fold q scale into Wq and
    # the g_norm per-channel weight into Wo^T rows (exact algebraic fusions).
    w_fused = jnp.concatenate(
        [params['Wq'] * (dk ** -0.5), params['Wk'], params['Wv'], params['Wg'], params['Ws']],
        axis=0)                                                        # (112, D)
    wot = params['Wo'].T * jnp.tile(params['g_norm_weight'], h)[:, None]   # (h*dv, D)

    kern = functools.partial(
        _abc_kernel, t=t, h=h, dk=dk, dv=dv, m=m,
        eps=NORM_EPS, clamp_min=CLAMP_MIN, clamp_max=CLAMP_MAX)

    out = pl.pallas_call(
        kern,
        out_shape=jax.ShapeDtypeStruct((b * t, d), x.dtype),
        grid=(b,),
        in_specs=[pl.BlockSpec((t, d), lambda i: (i, 0)),
                  pl.BlockSpec(w_fused.shape, lambda i: (0, 0)),
                  pl.BlockSpec(wot.shape, lambda i: (0, 0))],
        out_specs=pl.BlockSpec((t, d), lambda i: (i, 0)),
        compiler_params=pltpu.CompilerParams(dimension_semantics=("parallel",)),
    )(x.reshape(b * t, d), w_fused, wot)
    return out.reshape(b, t, d)
    # TODO(synk): past_key_values / use_cache incremental-decoding path is not implemented.
    # TODO(synk): production-T path: chunked state-carrying recurrence over an "arbitrary"
    # grid axis with per-chip chunk sizing (smaller on v7x) and explicit vmem_limit_bytes;
    # cast MXU operands to bf16 (keep f32 accumulation) once compute-bound.


# ----------------------------- params (deterministic) --------------------------------
def xavier_uniform(key, shape, gain=2 ** (-2.5)):
    fan_out, fan_in = shape
    a = gain * (6.0 / (fan_in + fan_out)) ** 0.5
    return jax.random.uniform(key, shape, jnp.float32, -a, a)


def init_params(key):
    ks = jax.random.split(key, 6)
    return dict(
        Wq=xavier_uniform(ks[0], (KEY_DIM, HIDDEN)),
        Wk=xavier_uniform(ks[1], (KEY_DIM, HIDDEN)),
        Wv=xavier_uniform(ks[2], (VALUE_DIM, HIDDEN)),
        Wg=xavier_uniform(ks[3], (VALUE_DIM, HIDDEN)),
        Ws=xavier_uniform(ks[4], (NUM_HEADS * NUM_SLOTS, HIDDEN)),
        Wo=xavier_uniform(ks[5], (HIDDEN, VALUE_DIM)),
        g_norm_weight=jnp.ones((HEAD_V,), jnp.float32),
    )


# ----------------------------- NumPy reference (naive recurrent ABC) ------------------
def _np_softmax(x, axis=-1):
    x = x - x.max(axis=axis, keepdims=True)
    e = np.exp(x)
    return e / e.sum(axis=axis, keepdims=True)


def reference_forward(x, params):
    x = np.asarray(x, np.float64)
    p = {k: np.asarray(v, np.float64) for k, v in params.items()}
    bb, tt, d = x.shape
    h = NUM_HEADS
    q = x @ p['Wq'].T
    k = x @ p['Wk'].T
    v = x @ p['Wv'].T
    g = x @ p['Wg'].T
    s = np.clip(x @ p['Ws'].T, CLAMP_MIN, CLAMP_MAX)

    def split(a, hd):
        return a.reshape(bb, tt, h, hd).transpose(0, 2, 1, 3)

    q, k, v, s = split(q, HEAD_K), split(k, HEAD_K), split(v, HEAD_V), split(s, NUM_SLOTS)
    K, V, M = HEAD_K, HEAD_V, NUM_SLOTS
    scale = K ** -0.5

    z = np.zeros_like(s)
    run = np.full((bb, h, M), -np.inf)
    for t in range(tt):
        run = np.logaddexp(run, s[:, :, t])
        z[:, :, t] = run
    gdec = np.concatenate([z[:, :, :1], z[:, :, :-1]], axis=2) - z
    ps = np.exp(s - z)

    hk = np.zeros((bb, h, K, M))
    ok = np.zeros((bb, h, tt, M))
    for t in range(tt):
        hk = hk * np.exp(gdec[:, :, t])[:, :, None, :] \
             + k[:, :, t][..., None] * ps[:, :, t][:, :, None, :]
        ok[:, :, t] = np.einsum('bhk,bhkm->bhm', q[:, :, t] * scale, hk)
    qv = _np_softmax(ok, -1)
    hv = np.zeros((bb, h, M, V))
    ov = np.zeros((bb, h, tt, V))
    for t in range(tt):
        hv = hv * np.exp(gdec[:, :, t])[..., None] \
             + ps[:, :, t][..., None] * v[:, :, t][:, :, None, :]
        ov[:, :, t] = np.einsum('bhm,bhmv->bhv', qv[:, :, t], hv)

    o = ov.transpose(0, 2, 1, 3)                      # (B, T, H, V)
    gg = g.reshape(bb, tt, h, V)
    rstd = 1.0 / np.sqrt((o ** 2).mean(-1, keepdims=True) + NORM_EPS)
    o = (o * rstd) * p['g_norm_weight'] * (gg * (1.0 / (1.0 + np.exp(-gg))))
    o = o.reshape(bb, tt, h * V)
    return o @ p['Wo'].T


# ----------------------------------- main --------------------------------------------
if __name__ == "__main__":
    key = jax.random.PRNGKey(0)
    kx, kp = jax.random.split(key)
    x = jax.random.normal(kx, (B, T, HIDDEN), jnp.float32)
    params = init_params(kp)

    fwd = jax.jit(functools.partial(abc_attention_forward, num_heads=NUM_HEADS))
    out = fwd(x, params)
    out = jax.block_until_ready(out)

    ref = reference_forward(x, params)
    np.testing.assert_allclose(np.asarray(out, np.float64), ref, atol=2e-3, rtol=2e-3)
    print("KERNEL_OK")
</pallas_src>

<mosaic_0001>
module attributes {stable_mosaic.version = 11 : i64} {
  func.func @_abc_kernel(%arg0: i32, %arg1: memref<8x32xf32, #tpu.memory_space<vmem>>, %arg2: memref<112x32xf32, #tpu.memory_space<vmem>>, %arg3: memref<32x32xf32, #tpu.memory_space<vmem>>, %arg4: memref<8x32xf32, #tpu.memory_space<vmem>>) attributes {dimension_semantics = [#tpu.dimension_semantics<parallel>], iteration_bounds = array<i64: 2>, scalar_prefetch = 0 : i64, scratch_operands = 0 : i64, tpu.core_type = #tpu.core_type<tc>, window_params = [{transform_indices = @transform_0, window_bounds = array<i64: 8, 32>}, {pipeline_mode = #tpu.pipeline_mode<synchronous>, transform_indices = @transform_1, window_bounds = array<i64: 112, 32>}, {pipeline_mode = #tpu.pipeline_mode<synchronous>, transform_indices = @transform_2, window_bounds = array<i64: 32, 32>}, {transform_indices = @transform_3, window_bounds = array<i64: 8, 32>}]} {
    %c0 = arith.constant 0 : index
    %c0_0 = arith.constant 0 : index
    %0 = vector.load %arg1[%c0, %c0_0] : memref<8x32xf32, #tpu.memory_space<vmem>>, vector<8x32xf32>
    %c0_1 = arith.constant 0 : index
    %c0_2 = arith.constant 0 : index
    %1 = vector.load %arg2[%c0_1, %c0_2] : memref<112x32xf32, #tpu.memory_space<vmem>>, vector<112x32xf32>
    %c0_3 = arith.constant 0 : index
    %c0_4 = arith.constant 0 : index
    %2 = vector.load %arg3[%c0_3, %c0_4] : memref<32x32xf32, #tpu.memory_space<vmem>>, vector<32x32xf32>
    %cst = arith.constant dense<0.000000e+00> : vector<112x8xf32>
    %3 = tpu.matmul %1, %0, %cst {dimension_numbers = #tpu.dot_dimension_numbers<[1], [1], [0], [0], [0, 0, 1, 0], [], []>} : vector<112x32xf32>, vector<8x32xf32>, vector<112x8xf32> -> vector<112x8xf32>
    %4 = tpu.iota {dimensions = array<i32: 0>} : vector<8x8xi32>
    %5 = tpu.iota {dimensions = array<i32: 1>} : vector<8x8xi32>
    %6 = arith.cmpi sle, %4, %5 : vector<8x8xi32>
    %7 = arith.extui %6 : vector<8x8xi1> to vector<8x8xi32>
    %8 = arith.sitofp %7 : vector<8x8xi32> to vector<8x8xf32>
    %9 = vector.extract_strided_slice %3 {offsets = [0, 0], sizes = [8, 8], strides = [1, 1]} : vector<112x8xf32> to vector<8x8xf32>
    %10 = vector.extract_strided_slice %3 {offsets = [16, 0], sizes = [8, 8], strides = [1, 1]} : vector<112x8xf32> to vector<8x8xf32>
    %11 = vector.extract_strided_slice %3 {offsets = [32, 0], sizes = [16, 8], strides = [1, 1]} : vector<112x8xf32> to vector<16x8xf32>
    %12 = vector.extract_strided_slice %3 {offsets = [64, 0], sizes = [16, 8], strides = [1, 1]} : vector<112x8xf32> to vector<16x8xf32>
    %13 = vector.extract_strided_slice %3 {offsets = [96, 0], sizes = [8, 8], strides = [1, 1]} : vector<112x8xf32> to vector<8x8xf32>
    %cst_5 = arith.constant -3.200000e+01 : f32
    %cst_6 = arith.constant 3.200000e+01 : f32
    %14 = vector.broadcast %cst_5 : f32 to vector<8x8xf32>
    %15 = arith.maximumf %14, %13 : vector<8x8xf32>
    %16 = vector.broadcast %cst_6 : f32 to vector<8x8xf32>
    %17 = arith.minimumf %16, %15 : vector<8x8xf32>
    %cst_7 = arith.constant dense<0xFF800000> : vector<8xf32>
    %18 = vector.multi_reduction <maximumf>, %17, %cst_7 [1] : vector<8x8xf32> to vector<8xf32>
    %19 = vector.shape_cast %18 : vector<8xf32> to vector<8x1xf32>
    %20 = vector.broadcast %19 : vector<8x1xf32> to vector<8x8xf32>
    %21 = arith.subf %17, %20 : vector<8x8xf32>
    %22 = math.exp %21 : vector<8x8xf32>
    %cst_8 = arith.constant dense<0.000000e+00> : vector<8x8xf32>
    %23 = tpu.matmul %22, %8, %cst_8 {dimension_numbers = #tpu.dot_dimension_numbers<[1], [0], [0], [1], [0, 0, 1, 1], [], []>} : vector<8x8xf32>, vector<8x8xf32>, vector<8x8xf32> -> vector<8x8xf32>
    %24 = tpu.reciprocal %23 {approx = true} : vector<8x8xf32> -> vector<8x8xf32>
    %cst_9 = arith.constant dense<0.000000e+00> : vector<8x8xf32>
    %25 = tpu.matmul %10, %9, %cst_9 {dimension_numbers = #tpu.dot_dimension_numbers<[0], [0], [1], [1], [0, 1, 1, 1], [], []>} : vector<8x8xf32>, vector<8x8xf32>, vector<8x8xf32> -> vector<8x8xf32>
    %26 = arith.mulf %25, %8 : vector<8x8xf32>
    %cst_10 = arith.constant dense<0.000000e+00> : vector<8x8xf32>
    %27 = tpu.matmul %22, %26, %cst_10 {dimension_numbers = #tpu.dot_dimension_numbers<[1], [0], [0], [1], [0, 0, 1, 1], [], []>} : vector<8x8xf32>, vector<8x8xf32>, vector<8x8xf32> -> vector<8x8xf32>
    %28 = arith.mulf %27, %24 : vector<8x8xf32>
    %cst_11 = arith.constant dense<0xFF800000> : vector<8xf32>
    %29 = vector.multi_reduction <maximumf>, %28, %cst_11 [0] : vector<8x8xf32> to vector<8xf32>
    %30 = vector.shape_cast %29 : vector<8xf32> to vector<1x8xf32>
    %31 = vector.broadcast %30 : vector<1x8xf32> to vector<8x8xf32>
    %32 = arith.subf %28, %31 : vector<8x8xf32>
    %33 = math.exp %32 : vector<8x8xf32>
    %cst_12 = arith.constant dense<0.000000e+00> : vector<8xf32>
    %34 = vector.multi_reduction <add>, %33, %cst_12 [0] : vector<8x8xf32> to vector<8xf32>
    %35 = vector.shape_cast %34 : vector<8xf32> to vector<1x8xf32>
    %36 = tpu.reciprocal %35 {approx = true} : vector<1x8xf32> -> vector<1x8xf32>
    %37 = vector.broadcast %36 : vector<1x8xf32> to vector<8x8xf32>
    %38 = arith.mulf %33, %37 : vector<8x8xf32>
    %39 = arith.mulf %38, %24 : vector<8x8xf32>
    %cst_13 = arith.constant dense<0.000000e+00> : vector<8x8xf32>
    %40 = tpu.matmul %22, %39, %cst_13 {dimension_numbers = #tpu.dot_dimension_numbers<[0], [0], [1], [1], [0, 1, 1, 1], [], []>} : vector<8x8xf32>, vector<8x8xf32>, vector<8x8xf32> -> vector<8x8xf32>
    %41 = arith.mulf %40, %8 : vector<8x8xf32>
    %cst_14 = arith.constant dense<0.000000e+00> : vector<16x8xf32>
    %42 = tpu.matmul %11, %41, %cst_14 {dimension_numbers = #tpu.dot_dimension_numbers<[1], [0], [0], [1], [0, 0, 1, 1], [], []>} : vector<16x8xf32>, vector<8x8xf32>, vector<16x8xf32> -> vector<16x8xf32>
    %43 = arith.mulf %42, %42 : vector<16x8xf32>
    %cst_15 = arith.constant dense<0.000000e+00> : vector<8xf32>
    %44 = vector.multi_reduction <add>, %43, %cst_15 [0] : vector<16x8xf32> to vector<8xf32>
    %45 = vector.shape_cast %44 : vector<8xf32> to vector<1x8xf32>
    %cst_16 = arith.constant 1.600000e+01 : f32
    %46 = vector.broadcast %cst_16 : f32 to vector<1x8xf32>
    %47 = arith.divf %45, %46 : vector<1x8xf32>
    %cst_17 = arith.constant 9.99999974E-6 : f32
    %48 = vector.broadcast %cst_17 : f32 to vector<1x8xf32>
    %49 = arith.addf %47, %48 : vector<1x8xf32>
    %50 = math.rsqrt %49 : vector<1x8xf32>
    %51 = vector.broadcast %50 : vector<1x8xf32> to vector<16x8xf32>
    %52 = arith.mulf %42, %51 : vector<16x8xf32>
    %cst_18 = arith.constant 0.000000e+00 : f32
    %53 = vector.broadcast %cst_18 : f32 to vector<16x8xf32>
    %54 = arith.subf %53, %12 : vector<16x8xf32>
    %55 = math.exp %54 : vector<16x8xf32>
    %cst_19 = arith.constant 1.000000e+00 : f32
    %56 = vector.broadcast %cst_19 : f32 to vector<16x8xf32>
    %57 = arith.addf %56, %55 : vector<16x8xf32>
    %58 = tpu.reciprocal %57 {approx = true} : vector<16x8xf32> -> vector<16x8xf32>
    %59 = arith.mulf %12, %58 : vector<16x8xf32>
    %60 = arith.mulf %52, %59 : vector<16x8xf32>
    %61 = vector.extract_strided_slice %2 {offsets = [0, 0], sizes = [16, 32], strides = [1, 1]} : vector<32x32xf32> to vector<16x32xf32>
    %cst_20 = arith.constant dense<0.000000e+00> : vector<8x32xf32>
    %62 = tpu.matmul %60, %61, %cst_20 {dimension_numbers = #tpu.dot_dimension_numbers<[0], [0], [1], [1], [0, 1, 1, 1], [], []>} : vector<16x8xf32>, vector<16x32xf32>, vector<8x32xf32> -> vector<8x32xf32>
    %63 = vector.extract_strided_slice %3 {offsets = [8, 0], sizes = [8, 8], strides = [1, 1]} : vector<112x8xf32> to vector<8x8xf32>
    %64 = vector.extract_strided_slice %3 {offsets = [24, 0], sizes = [8, 8], strides = [1, 1]} : vector<112x8xf32> to vector<8x8xf32>
    %65 = vector.extract_strided_slice %3 {offsets = [48, 0], sizes = [16, 8], strides = [1, 1]} : vector<112x8xf32> to vector<16x8xf32>
    %66 = vector.extract_strided_slice %3 {offsets = [80, 0], sizes = [16, 8], strides = [1, 1]} : vector<112x8xf32> to vector<16x8xf32>
    %67 = vector.extract_strided_slice %3 {offsets = [104, 0], sizes = [8, 8], strides = [1, 1]} : vector<112x8xf32> to vector<8x8xf32>
    %cst_21 = arith.constant -3.200000e+01 : f32
    %cst_22 = arith.constant 3.200000e+01 : f32
    %68 = vector.broadcast %cst_21 : f32 to vector<8x8xf32>
    %69 = arith.maximumf %68, %67 : vector<8x8xf32>
    %70 = vector.broadcast %cst_22 : f32 to vector<8x8xf32>
    %71 = arith.minimumf %70, %69 : vector<8x8xf32>
    %cst_23 = arith.constant dense<0xFF800000> : vector<8xf32>
    %72 = vector.multi_reduction <maximumf>, %71, %cst_23 [1] : vector<8x8xf32> to vector<8xf32>
    %73 = vector.shape_cast %72 : vector<8xf32> to vector<8x1xf32>
    %74 = vector.broadcast %73 : vector<8x1xf32> to vector<8x8xf32>
    %75 = arith.subf %71, %74 : vector<8x8xf32>
    %76 = math.exp %75 : vector<8x8xf32>
    %cst_24 = arith.constant dense<0.000000e+00> : vector<8x8xf32>
    %77 = tpu.matmul %76, %8, %cst_24 {dimension_numbers = #tpu.dot_dimension_numbers<[1], [0], [0], [1], [0, 0, 1, 1], [], []>} : vector<8x8xf32>, vector<8x8xf32>, vector<8x8xf32> -> vector<8x8xf32>
    %78 = tpu.reciprocal %77 {approx = true} : vector<8x8xf32> -> vector<8x8xf32>
    %cst_25 = arith.constant dense<0.000000e+00> : vector<8x8xf32>
    %79 = tpu.matmul %64, %63, %cst_25 {dimension_numbers = #tpu.dot_dimension_numbers<[0], [0], [1], [1], [0, 1, 1, 1], [], []>} : vector<8x8xf32>, vector<8x8xf32>, vector<8x8xf32> -> vector<8x8xf32>
    %80 = arith.mulf %79, %8 : vector<8x8xf32>
    %cst_26 = arith.constant dense<0.000000e+00> : vector<8x8xf32>
    %81 = tpu.matmul %76, %80, %cst_26 {dimension_numbers = #tpu.dot_dimension_numbers<[1], [0], [0], [1], [0, 0, 1, 1], [], []>} : vector<8x8xf32>, vector<8x8xf32>, vector<8x8xf32> -> vector<8x8xf32>
    %82 = arith.mulf %81, %78 : vector<8x8xf32>
    %cst_27 = arith.constant dense<0xFF800000> : vector<8xf32>
    %83 = vector.multi_reduction <maximumf>, %82, %cst_27 [0] : vector<8x8xf32> to vector<8xf32>
    %84 = vector.shape_cast %83 : vector<8xf32> to vector<1x8xf32>
    %85 = vector.broadcast %84 : vector<1x8xf32> to vector<8x8xf32>
    %86 = arith.subf %82, %85 : vector<8x8xf32>
    %87 = math.exp %86 : vector<8x8xf32>
    %cst_28 = arith.constant dense<0.000000e+00> : vector<8xf32>
    %88 = vector.multi_reduction <add>, %87, %cst_28 [0] : vector<8x8xf32> to vector<8xf32>
    %89 = vector.shape_cast %88 : vector<8xf32> to vector<1x8xf32>
    %90 = tpu.reciprocal %89 {approx = true} : vector<1x8xf32> -> vector<1x8xf32>
    %91 = vector.broadcast %90 : vector<1x8xf32> to vector<8x8xf32>
    %92 = arith.mulf %87, %91 : vector<8x8xf32>
    %93 = arith.mulf %92, %78 : vector<8x8xf32>
    %cst_29 = arith.constant dense<0.000000e+00> : vector<8x8xf32>
    %94 = tpu.matmul %76, %93, %cst_29 {dimension_numbers = #tpu.dot_dimension_numbers<[0], [0], [1], [1], [0, 1, 1, 1], [], []>} : vector<8x8xf32>, vector<8x8xf32>, vector<8x8xf32> -> vector<8x8xf32>
    %95 = arith.mulf %94, %8 : vector<8x8xf32>
    %cst_30 = arith.constant dense<0.000000e+00> : vector<16x8xf32>
    %96 = tpu.matmul %65, %95, %cst_30 {dimension_numbers = #tpu.dot_dimension_numbers<[1], [0], [0], [1], [0, 0, 1, 1], [], []>} : vector<16x8xf32>, vector<8x8xf32>, vector<16x8xf32> -> vector<16x8xf32>
    %97 = arith.mulf %96, %96 : vector<16x8xf32>
    %cst_31 = arith.constant dense<0.000000e+00> : vector<8xf32>
    %98 = vector.multi_reduction <add>, %97, %cst_31 [0] : vector<16x8xf32> to vector<8xf32>
    %99 = vector.shape_cast %98 : vector<8xf32> to vector<1x8xf32>
    %cst_32 = arith.constant 1.600000e+01 : f32
    %100 = vector.broadcast %cst_32 : f32 to vector<1x8xf32>
    %101 = arith.divf %99, %100 : vector<1x8xf32>
    %cst_33 = arith.constant 9.99999974E-6 : f32
    %102 = vector.broadcast %cst_33 : f32 to vector<1x8xf32>
    %103 = arith.addf %101, %102 : vector<1x8xf32>
    %104 = math.rsqrt %103 : vector<1x8xf32>
    %105 = vector.broadcast %104 : vector<1x8xf32> to vector<16x8xf32>
    %106 = arith.mulf %96, %105 : vector<16x8xf32>
    %cst_34 = arith.constant 0.000000e+00 : f32
    %107 = vector.broadcast %cst_34 : f32 to vector<16x8xf32>
    %108 = arith.subf %107, %66 : vector<16x8xf32>
    %109 = math.exp %108 : vector<16x8xf32>
    %cst_35 = arith.constant 1.000000e+00 : f32
    %110 = vector.broadcast %cst_35 : f32 to vector<16x8xf32>
    %111 = arith.addf %110, %109 : vector<16x8xf32>
    %112 = tpu.reciprocal %111 {approx = true} : vector<16x8xf32> -> vector<16x8xf32>
    %113 = arith.mulf %66, %112 : vector<16x8xf32>
    %114 = arith.mulf %106, %113 : vector<16x8xf32>
    %115 = vector.extract_strided_slice %2 {offsets = [16, 0], sizes = [16, 32], strides = [1, 1]} : vector<32x32xf32> to vector<16x32xf32>
    %cst_36 = arith.constant dense<0.000000e+00> : vector<8x32xf32>
    %116 = tpu.matmul %114, %115, %cst_36 {dimension_numbers = #tpu.dot_dimension_numbers<[0], [0], [1], [1], [0, 1, 1, 1], [], []>} : vector<16x8xf32>, vector<16x32xf32>, vector<8x32xf32> -> vector<8x32xf32>
    %117 = arith.addf %62, %116 : vector<8x32xf32>
    %c0_37 = arith.constant 0 : index
    %c0_38 = arith.constant 0 : index
    %118 = vector.load %arg4[%c0_37, %c0_38] : memref<8x32xf32, #tpu.memory_space<vmem>>, vector<8x32xf32>
    tpu.vector_store %arg4[%c0_37, %c0_38], %117 {strides = array<i32>} : memref<8x32xf32, #tpu.memory_space<vmem>>, vector<8x32xf32>,
    return
  }
  func.func @transform_0(%arg0: i32) -> (i32, i32) {
    %c0_i32 = arith.constant 0 : i32
    %c0_i32_0 = arith.constant 0 : i32
    return %arg0, %c0_i32 : i32, i32
  }
  func.func @transform_1(%arg0: i32) -> (i32, i32) {
    %c0_i32 = arith.constant 0 : i32
    %c0_i32_0 = arith.constant 0 : i32
    %c0_i32_1 = arith.constant 0 : i32
    return %c0_i32, %c0_i32_0 : i32, i32
  }
  func.func @transform_2(%arg0: i32) -> (i32, i32) {
    %c0_i32 = arith.constant 0 : i32
    %c0_i32_0 = arith.constant 0 : i32
    %c0_i32_1 = arith.constant 0 : i32
    return %c0_i32, %c0_i32_0 : i32, i32
  }
  func.func @transform_3(%arg0: i32) -> (i32, i32) {
    %c0_i32 = arith.constant 0 : i32
    %c0_i32_0 = arith.constant 0 : i32
    return %arg0, %c0_i32 : i32, i32
  }
}

</mosaic_0001>

<bundles_post_ra>
// kernel: tile.8
= control target key start
LH: loop header
LB: loop body
LE: loop exit
PB: predicated region body
PF: predicated region fallthrough
CT: control target
= control target key end

     0   :  { %s22_s0 = inlined_call_operand.vmem [shape: f32[16], index: 0, kind: input, shape index: {}]   ;;  %s23_s1 = inlined_call_operand.vmem [shape: f32[2,16], index: 1, kind: output, shape index: {}]  }
   0x1   :  { %v4_v0 = vld [vmem:[%s22_s0] ss:$0 sm:$0xff] }
   0x2   :  { %5 = vst [vmem:[%s23_s1] sm:$0x3] %v4_v0 }

// kernel: mul.9
= control target key start
LH: loop header
LB: loop body
LE: loop exit
PB: predicated region body
PF: predicated region fallthrough
CT: control target
= control target key end

     0   :  { %vm7_vm0 = vcmask 130048   ;;  %vm13_vm1 = vcmask 261248   ;;  %s39_s0 = inlined_call_operand.vmem [shape: f32[2,16], index: 0, kind: input, shape index: {}]   ;;  %s40_s1 = inlined_call_operand.vmem [shape: f32[32], index: 1, kind: output, shape index: {}]  }
   0x1   :  { %v4_v0 = vld [vmem:[%s39_s0] sm:$0x3]  ;;  %s22_s0 = smov 16  }
   0x2   :  { %5 = vst [vmem:[#allocation1] sm:$0x3] %v4_v0 }
   0x9   :  { %v10_v1 = vld [vmem:[#allocation1 + $0x1] sm:$0x1]   ;;  %v6_v2 = vld [vmem:[#allocation1] sm:$0x1]  }
   0xa   :  { %11 = vrot.lane.b32.xlu0 %v10_v1, %s22_s0  ;;  %8 = vst.msk [vmem:[#allocation0] sm:$0x1] %vm7_vm0, %v6_v2  }
  0x7c   :  { %v12_v3 = vpop.permute.xlu0 %11  }
  0x7d   :  { %14 = vst.msk [vmem:[#allocation0] sm:$0x1] %vm13_vm1, %v12_v3  }
  0x84   :  { %v18_v4 = vld [vmem:[#allocation0] sm:$0x1] }
  0x85   :  { %20 = vst [vmem:[%s40_s1] sm:$0x1] %v18_v4 }

// kernel: abc_attention_forward.1
= control target key start
LH: loop header
LB: loop body
LE: loop exit
PB: predicated region body
PF: predicated region fallthrough
CT: control target
= control target key end

     0   :  { %8 = vsyncpa [#allocation3], 0  ;;  %s2289_s0 = inlined_call_operand.vmem [shape: f32[16,32], index: 0, kind: input, shape index: {}]   ;;  %s2290_s1 = inlined_call_operand.vmem [shape: f32[112,32], index: 1, kind: input, shape index: {}]   ;;  %s2291_s2 = inlined_call_operand.vmem [shape: f32[32,32], index: 2, kind: input, shape index: {}]   ;;  %s2292_s3 = inlined_call_operand.hbm [shape: f32[16,32], index: 3, kind: output, shape index: {}]  }
   0x1   :  { %10 = vsyncpa [#allocation3 + $0x1], 0  ;;  %s2002_s12 = smov 0   ;;  %s2004_s13 = smov 0  }
   0x2   :  { %s2006_s14 = smov 0   ;;  %s2008_s15 = smov 0  }
   0x3 LB: > { %s2023_s16 = sadd.s32 4294967295, %s1975_s15   ;;  %s1652_s17 = sadd.s32 4294967294, %s1975_s15   ;;  %s1975_s15 = sphi %s2008_s15, %s2298_s15   ;;  %s1971_s14 = sphi %s2006_s14, %s2297_s14   ;;  %s1967_s13 = sphi %s2004_s13, %s2296_s13   ;;  %s1963_s12 = sphi %s2002_s12, %s2295_s12  }
   0x4   : > { %s2027_s18 = sadd.s32 1, %s1975_s15   ;;  %s91_s19 = sadd.s32 1, %s1971_s14 }
   0x5   : > { %s88_s20 = ssub.s32 %s1975_s15, %s2027_s18  ;;  %p101_p0 = scmp.ne.s32.totalorder %s1971_s14, %s1967_s13 }
   0x6   : > { %p89_p1 = scmp.eq.s32.totalorder %s88_s20, 0  ;;  %p102_p2 = scmp.eq.s32.totalorder %s2023_s16, 1 }
   0x7   : > { %p107_p3 = scmp.ne.s32.totalorder %s1967_s13, %s1963_s12  ;;  %p108_p4 = scmp.eq.s32.totalorder %s1652_s17, 1 }
   0x8   : > { %s2038_s21 = scalar_select %p89_p1, %s1971_s14, %s91_s19  }
   0x9   : > { %p2040_p5 = por %p102_p2, %p101_p0  ;;  %p2044_p6 = por %p108_p4, %p107_p3 }
   0xa   : > { %p1655_p7 = scmp.ge.s32.totalorder %s1975_s15, 1  ;;  %p139_p8 = scmp.lt.s32.totalorder %s1975_s15, 3 }
   0xc   : > { %p140_p9 = pnand %p1655_p7, %p139_p8 }
   0xd   : > { %p162_p10 = scmp.lt.s32.totalorder (!%p140_p9), %s2023_s16, 1  ;;  %vm185_vm0 = vcmask (!%p140_p9), 261120   ;;  %v167_v0 = vld [vmem:[%s2290_s1] sm:$0xff] (!%p140_p9)  ;;  %v168_v2 = vld [vmem:[%s2290_s1 + $0x8] sm:$0xff] (!%p140_p9)  ;;  %v169_v3 = vld [vmem:[%s2290_s1 + $0x10] sm:$0xff] (!%p140_p9)  ;;  %vm375_vm1 = vcmask (!%p140_p9), 64512   ;;  %v366_v31 = vlaneseq (!%p140_p9) }
   0xe   : > { %143 = sbr.rel (%p140_p9) target bundleno = 2468 (0x9a4), region = 32  ;;  %1741 = vmatprep.mubr.msk.f32.mxu0 (!%p140_p9), %vm185_vm0, %v167_v0  ;;  %v170_v4 = vld [vmem:[%s2290_s1 + $0x18] sm:$0xff] (!%p140_p9)  ;;  %v171_v5 = vld [vmem:[%s2290_s1 + $0x20] sm:$0xff] (!%p140_p9)  ;;  %v172_v6 = vld [vmem:[%s2290_s1 + $0x28] sm:$0xff] (!%p140_p9)  ;;  %v1977_v32 = vmov (!%p140_p9), 0.0   ;;  %vm1978_vm2 = vmmov (!%p140_p9), 0  }
   0xf   : > { %v173_v7 = vld [vmem:[%s2290_s1 + $0x30] sm:$0xff] (!%p140_p9)  ;;  %v174_v8 = vld [vmem:[%s2290_s1 + $0x38] sm:$0xff] (!%p140_p9)  ;;  %v175_v9 = vld [vmem:[%s2290_s1 + $0x40] sm:$0xff] (!%p140_p9)  ;;  %1762 = vmatprep.subr.mxu1 (!%p140_p9), %v1977_v32  ;;  %1764 = vmatprep.mubr.msk.f32.mxu1 (!%p140_p9), %vm1978_vm2, %v1977_v32  ;;  %v2135_v33 = vshrl.u32 (!%p140_p9), %v366_v31, 7  ;;  %v2137_v34 = vand.u32 (!%p140_p9), 127, %v366_v31  ;;  %v1979_v35 = vmov (!%p140_p9), 1.0  }
  0x10   : > { %v176_v10 = vld [vmem:[%s2290_s1 + $0x48] sm:$0xff] (!%p140_p9)  ;;  %v177_v11 = vld [vmem:[%s2290_s1 + $0x50] sm:$0xff] (!%p140_p9)  ;;  %v178_v12 = vld [vmem:[%s2290_s1 + $0x58] sm:$0xff] (!%p140_p9)  ;;  %vm1399_vm4 = vcmask (!%p140_p9), 130048   ;;  %s159_s29 = sand.u32 (!%p140_p9), 1, %s1967_s13   ;;  %s1693_s4 = sshll.u32 (!%p140_p9), %s2023_s16, 7 }
  0x11   : > { %v179_v13 = vld [vmem:[%s2290_s1 + $0x60] sm:$0xff] (!%p140_p9)  ;;  %v180_v14 = vld [vmem:[%s2290_s1 + $0x68] sm:$0xff] (!%p140_p9)  ;;  %vm370_vm3 = vcmp.le.s32.totalorder (!%p140_p9), %v2135_v33, %v2137_v34  ;;  %s2246_s9 = scalar_lea.hbm (!%p140_p9), %s2292_s3, %s1693_s4  ;;  %s1580_s10 = scalar_lea.sflag (!%p140_p9), [#allocation3], %s159_s29 }
  0x12   : > { %1763 = vmatpush3.msk.msra.mxu1 (!%p140_p9), %vm370_vm3, %v1979_v35  ;;  %v2163_v50 = vsel (!%p140_p9), %vm370_vm3, 1.0, %v1977_v32 }
  0x13   : > { %1767 = vmatprep.subr.mxu1 (!%p140_p9), %v1977_v32 }
  0x15   : > { %s163_s26 = scalar_select %p162_p10, %s2023_s16, 1 }
  0x16   : > { %s1981_s16 = smov [#allocation2]  }
  0x17   : > { %s1657_s27 = sshll.u32 %s163_s26, 3  ;;  %s1917_s17 = sshll.u32 %s1981_s16, 4  ;;  %s1918_s17 = int_to_ptr.vmem [resolvable:$false] %s1917_s17 }
  0x18   : > { %s165_s30 = scalar_lea.vmem %s2289_s0, %s1657_s27  ;;  %s1919_s19 = scalar_lea.vmem %s1918_s17, 256 }
  0x19   : > { %v166_v1 = vld [vmem:[%s165_s30] sm:$0xff]  ;;  %s1656_s30 = sshll.u32 %s159_s29, 3 }
  0x1a   : > { %1739 = vmatprep.subr.msk.mxu0 %vm185_vm0, %v166_v1  ;;  %s161_s5 = scalar_lea.vmem [#allocation2], %s1656_s30 }
  0x1b   : > { %1740 = vmatpush3.xpose.msk.msra.mxu0 %vm185_vm0, %v166_v1  ;;  %s1593_s6 = sshll.u32 %s161_s5, 4  ;;  %s2248_s6 = int_to_ptr.vmem [resolvable:$true] %s1593_s6 }
  0x1c   : > { %s1913_s11 = scalar_lea.vmem %s2248_s6, 128  ;;  %p1920_p0 = scmp.lt.s32.totalorder %s2248_s6, %s1918_s17 }
  0x1d   : > { %p1914_p11 = scmp.ne.s32.totalorder %s2248_s6, %s1913_s11  ;;  %p1921_p1 = scmp.lt.s32.totalorder %s1919_s19, %s1913_s11 }
  0x1e   : > { %1742 = vmatmul.mubr.msk.f32.vlgmr.msra.gmra.mrb[0].mxu0 %vm185_vm0, %v168_v2 }
  0x1f   : > { %1744 = vmatprep.mubr.msk.f32.mxu0 %vm185_vm0, %v169_v3  ;;  %p1915_p12 = pnand %p1914_p11, %p2040_p5  ;;  %p1922_p2 = por %p1921_p1, %p1920_p0 }
  0x21   : > { %p1916_p13 = pneg %p1915_p12 }
  0x22   : > { %1745 = vmatmul.mubr.msk.f32.gmra.mrb[2].mxu0 %vm185_vm0, %v170_v4 }
  0x23   : > { %1747 = vmatprep.mubr.msk.f32.mxu0 %vm185_vm0, %v171_v5  ;;  %p1923_p3 = pnand %p1922_p2, %p1916_p13 }
  0x26   : > { %1748 = vmatmul.mubr.msk.f32.gmra.mrb[4].mxu0 %vm185_vm0, %v172_v6 }
  0x27   : > { %1750 = vmatprep.mubr.msk.f32.mxu0 %vm185_vm0, %v173_v7 }
  0x2a   : > { %1751 = vmatmul.mubr.msk.f32.gmra.mrb[6].mxu0 %vm185_vm0, %v174_v8 }
  0x2b   : > { %1753 = vmatprep.mubr.msk.f32.mxu0 %vm185_vm0, %v175_v9 }
  0x2e   : > { %1754 = vmatmul.mubr.msk.f32.gmra.mrb[8].mxu0 %vm185_vm0, %v176_v10 }
  0x2f   : > { %1756 = vmatprep.mubr.msk.f32.mxu0 %vm185_vm0, %v177_v11 }
  0x32   : > { %1757 = vmatmul.mubr.msk.f32.gmra.mrb[10].mxu0 %vm185_vm0, %v178_v12 }
  0x33   : > { %1759 = vmatprep.mubr.msk.f32.mxu0 %vm185_vm0, %v179_v13 }
  0x36   : > { %1760 = vmatmul.mubr.msk.f32.gmra.mrb[12].mxu0 %vm185_vm0, %v180_v14 }
  0x37   : > { %1816 = vmatprep.mubr.msk.f32.mxu0 %vm1978_vm2, %v1977_v32 }
  0xf1   : > { %v2113_v15 = vpop.f32.mrb[0].mxu0 }
  0xf2   : > { %v297_v16 = vpop.f32.mrb[1].mxu0 }
  0xf5   : > { %v1746_v17 = vpop.f32.mrb[2].mxu0 }
  0xf6   : > { %v307_v18 = vpop.f32.mrb[3].mxu0 }
  0xf9   : > { %v2115_v19 = vpop.f32.mrb[4].mxu0 }
  0xfa   : > { %v2117_v20 = vpop.f32.mrb[5].mxu0 }
  0xfd   : > { %v2119_v21 = vpop.f32.mrb[6].mxu0 }
  0xfe   : > { %v2121_v22 = vpop.f32.mrb[7].mxu0 }
 0x101   : > { %v2123_v23 = vpop.f32.mrb[8].mxu0 }
 0x102   : > { %v2125_v24 = vpop.f32.mrb[9].mxu0 }
 0x105   : > { %v2127_v25 = vpop.f32.mrb[10].mxu0 }
 0x106   : > { %v2129_v26 = vpop.f32.mrb[11].mxu0 }
 0x109   : > { %v1761_v27 = vpop.f32.mrb[12].mxu0 }
 0x10a   : > { %v357_v28 = vpop.f32.mrb[13].mxu0  ;;  %v1682_v41 = vclamps-f32 %v1761_v27, 32.0 }
 0x10b   : > { %v1674_v29 = vclamps-f32 %v357_v28, 32.0 }
 0x10c   : > { %v873_v42 = vsel %vm375_vm1, %v1682_v41, -inf }
 0x10d   : > { %v376_v30 = vsel %vm375_vm1, %v1674_v29, -inf }
 0x10e   : > { %377 = vmax.xlane.f32.xlu0 %v376_v30 }
 0x13b   : > { %456 = vxpose.xlu0.b32.start.end [1/1] (short) (narrow) %v307_v18, 8 }
 0x19b   : > { %v378_v36 = vpop.xlane.xlu0 %377 }
 0x19c   : > { %v379_v37 = vsub.f32 %v1674_v29, %v378_v36 }
 0x19e   : > { %v380_v38 = vmul.f32 1.442695, %v379_v37 }
 0x1a0   : > { %1877 = vpow2.f32 %v380_v38 }
 0x1aa   : > { %v1878_v39 = vpop.eup %1877 }
 0x1ab   : > { %653 = vxpose.xlu1.b32.start.end [1/1] (short) (narrow) %v1878_v39, 8  ;;  %1765 = vmatmul.mubr.msk.f32.vlgmr.msra.gmra.mrb[0].mxu1 %vm375_vm1, %v1878_v39 }
 0x1ac   : > { %1768 = vmatpush3.msra.mxu1 %v297_v16  ;;  %1769 = vmatprep.mubr.msk.f32.mxu1 %vm1978_vm2, %v1977_v32 }
 0x1ad   : > { %1772 = vmatprep.subr.mxu1 %v1977_v32 }
 0x1bb   : > { %v472_v40 = vpop.trf.xlu0 }
 0x1bc   : > { %1770 = vmatmul.mubr.msk.f32.vlgmr.msra.gmra.mrb[2].mxu1 %vm375_vm1, %v472_v40 }
 0x1bd   : > { %1774 = vmatprep.mubr.msk.f32.mxu1 %vm1978_vm2, %v1977_v32 }
 0x1d2   : > { %874 = vmax.xlane.f32.xlu1 %v873_v42 }
 0x205   : > { %953 = vxpose.xlu1.b32.start.end [1/1] (short) (narrow) %v1746_v17, 8 }
 0x22b   : > { %v669_v43 = vpop.trf.xlu1 }
 0x25f   : > { %v875_v44 = vpop.xlane.xlu1 %874 }
 0x260   : > { %v876_v45 = vsub.f32 %v1682_v41, %v875_v44 }
 0x262   : > { %v877_v46 = vmul.f32 1.442695, %v876_v45 }
 0x264   : > { %1879 = vpow2.f32 %v877_v46 }
 0x26e   : > { %v2156_v47 = vpop.eup %1879 }
 0x26f   : > { %1150 = vxpose.xlu0.b32.start.end [1/1] (short) (narrow) %v2156_v47, 8 }
 0x27e   : > { %v451_v48 = vpop.f32.mrb[0].mxu1 }
 0x27f   : > { %v1766_v49 = vpop.f32.mrb[1].mxu1  ;;  %1881 = vrcp.f32 %v451_v48 }
 0x285   : > { %v969_v18 = vpop.trf.xlu1 }
 0x289   : > { %v1882_v54 = vpop.eup %1881 }
 0x28f   : > { %v557_v51 = vpop.f32.mrb[2].mxu1 }
 0x290   : > { %v561_v52 = vmul.f32 %v2163_v50, %v557_v51  ;;  %v1771_v53 = vpop.f32.mrb[3].mxu1 }
 0x292   : > { %1773 = vmatpush3.msra.mxu1 %v561_v52 }
 0x293   : > { %1775 = vmatmul.mubr.msk.f32.vlgmr.msra.gmra.mrb[4].mxu1 %vm375_vm1, %v1878_v39  ;;  %1777 = vmatprep.subr.mxu1 %v1977_v32 }
 0x294   : > { %1779 = vmatprep.mubr.msk.f32.mxu1 %vm1978_vm2, %v1977_v32 }
 0x366   : > { %v628_v55 = vpop.f32.mrb[4].mxu1 }
 0x367   : > { %v632_v56 = vmul.f32 %v1882_v54, %v628_v55  ;;  %v1776_v57 = vpop.f32.mrb[5].mxu1 }
 0x369   : > { %v633_v58 = vsel %vm375_vm1, %v632_v56, -inf }
 0x36a   : > { %v634_v59 = vrot.slane %v633_v58, 4 }
 0x36c   : > { %v635_v60 = vmax.f32 %v633_v58, %v634_v59 }
 0x36e   : > { %v636_v61 = vrot.slane %v635_v60, 2 }
 0x370   : > { %v637_v62 = vmax.f32 %v635_v60, %v636_v61 }
 0x372   : > { %v638_v63 = vrot.slane %v637_v62, 1 }
 0x374   : > { %v639_v0 = vmax.f32 %v637_v62, %v638_v63 }
 0x376   : > { %v640_v1 = vsub.f32 %v632_v56, %v639_v0 }
 0x378   : > { %v641_v2 = vmul.f32 1.442695, %v640_v1 }
 0x37a   : > { %1883 = vpow2.f32 %v641_v2 }
 0x384   : > { %v1884_v3 = vpop.eup %1883 }
 0x385   : > { %v643_v4 = vsel %vm375_vm1, %v1884_v3, 0.0 }
 0x386   : > { %v644_v5 = vrot.slane %v643_v4, 4 }
 0x388   : > { %v645_v6 = vadd.f32 %v644_v5, %v643_v4 }
 0x38a   : > { %v646_v7 = vrot.slane %v645_v6, 2 }
 0x38c   : > { %v647_v8 = vadd.f32 %v646_v7, %v645_v6 }
 0x38e   : > { %v648_v9 = vrot.slane %v647_v8, 1 }
 0x390   : > { %v649_v10 = vadd.f32 %v648_v9, %v647_v8 }
 0x392   : > { %1885 = vrcp.f32 %v649_v10 }
 0x39c   : > { %v1886_v11 = vpop.eup %1885 }
 0x39d   : > { %v651_v12 = vmul.f32 %v1886_v11, %v1884_v3 }
 0x39f   : > { %v652_v13 = vmul.f32 %v1882_v54, %v651_v12 }
 0x3a1   : > { %1778 = vmatpush3.msra.mxu1 %v652_v13 }
 0x3a2   : > { %1780 = vmatmul.mubr.msk.f32.vlgmr.msra.gmra.mrb[6].mxu1 %vm375_vm1, %v669_v43 }
 0x3a3   : > { %1784 = vmatprep.mubr.msk.f32.mxu1 %vm375_vm1, %v2117_v20  ;;  %v857_v20 = vsub.f32 0.0, %v2125_v24 }
 0x3a5   : > { %v859_v28 = vmul.f32 1.442695, %v857_v20 }
 0x475   : > { %v754_v14 = vpop.f32.mrb[6].mxu1 }
 0x476   : > { %v758_v16 = vmul.f32 %v2163_v50, %v754_v14  ;;  %v1781_v17 = vpop.f32.mrb[7].mxu1 }
 0x478   : > { %1782 = vmatprep.subr.mxu1 %v758_v16 }
 0x479   : > { %1783 = vmatpush3.msra.mxu1 %v758_v16 }
 0x47a   : > { %1785 = vmatmul.mubr.msk.f32.vlgmr.msra.gmra.mrb[8].mxu1 %vm375_vm1, %v2115_v19  ;;  %1787 = vmatprep.subr.mxu1 %v1977_v32  ;;  %v858_v19 = vsub.f32 0.0, %v2123_v23 }
 0x47b   : > { %1788 = vmatpush3.msk.msra.mxu1 %vm370_vm3, %v1979_v35  ;;  %1789 = vmatprep.mubr.msk.f32.mxu1 %vm1978_vm2, %v1977_v32 }
 0x47c   : > { %1792 = vmatprep.subr.mxu1 %v1977_v32  ;;  %v861_v27 = vmul.f32 1.442695, %v858_v19 }
 0x47e   : > { %1790 = vmatmul.mubr.msk.f32.vlgmr.msra.gmra.mrb[10].mxu1 %vm375_vm1, %v2156_v47  ;;  %1887 = vpow2.f32 %v861_v27 }
 0x47f   : > { %1793 = vmatpush3.msra.mxu1 %v2113_v15  ;;  %1794 = vmatprep.mubr.msk.f32.mxu1 %vm1978_vm2, %v1977_v32  ;;  %1889 = vpow2.f32 %v859_v28  ;;  %v1166_v28 = vpop.trf.xlu0 }
 0x480   : > { %1797 = vmatprep.subr.mxu1 %v1977_v32 }
 0x482   : > { %1795 = vmatmul.mubr.msk.f32.vlgmr.msra.gmra.mrb[12].mxu1 %vm375_vm1, %v969_v18 }
 0x483   : > { %1799 = vmatprep.mubr.msk.f32.mxu1 %vm1978_vm2, %v1977_v32 }
 0x488   : > { %v1888_v44 = vpop.eup %1887 }
 0x489   : > { %v1890_v46 = vpop.eup %1889  ;;  %v864_v49 = vadd.f32 1.0, %v1888_v44 }
 0x48a   : > { %v863_v51 = vadd.f32 1.0, %v1890_v46 }
 0x48b   : > { %1891 = vrcp.f32 %v864_v49 }
 0x48c   : > { %1893 = vrcp.f32 %v863_v51 }
 0x495   : > { %v1892_v55 = vpop.eup %1891 }
 0x496   : > { %v1894_v56 = vpop.eup %1893  ;;  %v868_v57 = vmul.f32 %v1892_v55, %v2123_v23 }
 0x497   : > { %v867_v58 = vmul.f32 %v1894_v56, %v2125_v24 }
 0x54d   : > { %v1786_v29 = vpop.f32.mrb[8].mxu1 }
 0x54e   : > { %v841_v30 = vmul.f32 %v1786_v29, %v1786_v29  ;;  %v831_v15 = vpop.f32.mrb[9].mxu1 }
 0x54f   : > { %v840_v31 = vmul.f32 %v831_v15, %v831_v15 }
 0x550   : > { %v843_v33 = vsel %vm375_vm1, %v841_v30, 0.0 }
 0x551   : > { %v842_v34 = vsel %vm375_vm1, %v840_v31, 0.0  ;;  %v948_v35 = vpop.f32.mrb[10].mxu1  ;;  %v183_v31 = vld [vmem:[%s2291_s2 + $0x10] sm:$0xff] }
 0x552   : > { %v844_v36 = vadd.f32 %v843_v33, %v842_v34  ;;  %v1791_v37 = vpop.f32.mrb[11].mxu1  ;;  %v184_v33 = vld [vmem:[%s2291_s2 + $0x18] sm:$0xff]  ;;  %v1980_v34 = vmov 0.0|0.0  }
 0x553   : > { %1826 = vmatprep.subr.bf16.mxu0 %v1980_v34 }
 0x554   : > { %v845_v38 = vrot.slane %v844_v36, 4 }
 0x555   : > { %v1054_v39 = vpop.f32.mrb[12].mxu1 }
 0x556   : > { %v846_v40 = vadd.f32 %v845_v38, %v844_v36  ;;  %v1058_v41 = vmul.f32 %v2163_v50, %v1054_v39  ;;  %v1796_v42 = vpop.f32.mrb[13].mxu1 }
 0x558   : > { %v847_v43 = vrot.slane %v846_v40, 2  ;;  %1798 = vmatpush3.msra.mxu1 %v1058_v41 }
 0x559   : > { %1800 = vmatmul.mubr.msk.f32.vlgmr.msra.gmra.mrb[14].mxu1 %vm375_vm1, %v2156_v47  ;;  %1802 = vmatprep.subr.mxu1 %v1977_v32 }
 0x55a   : > { %v848_v45 = vadd.f32 %v847_v43, %v846_v40  ;;  %1804 = vmatprep.mubr.msk.f32.mxu1 %vm1978_vm2, %v1977_v32 }
 0x55c   : > { %v849_v48 = vrot.slane %v848_v45, 1 }
 0x55e   : > { %v850_v52 = vadd.f32 %v849_v48, %v848_v45 }
 0x560   : > { %v852_v53 = vmul.f32 0.0625, %v850_v52 }
 0x562   : > { %v853_v54 = vadd.f32 1e-05, %v852_v53 }
 0x564   : > { %1895 = vrsqrt.f32 %v853_v54 }
 0x565   : > { %1897 = vrcp.f32 %v948_v35  ;;  %v1353_v35 = vsub.f32 0.0, %v2129_v26 }
 0x567   : > { %v1355_v37 = vmul.f32 1.442695, %v1353_v35 }
 0x56e   : > { %v1896_v47 = vpop.eup %1895 }
 0x56f   : > { %v855_v59 = vmul.f32 %v1896_v47, %v831_v15  ;;  %v856_v60 = vmul.f32 %v1896_v47, %v1786_v29  ;;  %v1898_v63 = vpop.eup %1897 }
 0x571   : > { %v2207_v61 = vmul.f32 %v867_v58, %v855_v59  ;;  %v2209_v62 = vmul.f32 %v868_v57, %v856_v60 }
 0x62c   : > { %v1125_v0 = vpop.f32.mrb[14].mxu1 }
 0x62d   : > { %v1129_v1 = vmul.f32 %v1898_v63, %v1125_v0  ;;  %v1801_v2 = vpop.f32.mrb[15].mxu1 }
 0x62f   : > { %v1130_v3 = vsel %vm375_vm1, %v1129_v1, -inf }
 0x630   : > { %v1131_v4 = vrot.slane %v1130_v3, 4 }
 0x632   : > { %v1132_v5 = vmax.f32 %v1130_v3, %v1131_v4  ;;  %v181_v4 = vld [vmem:[%s2291_s2] sm:$0xff] }
 0x634   : > { %v1133_v6 = vrot.slane %v1132_v5, 2 }
 0x636   : > { %v1134_v7 = vmax.f32 %v1132_v5, %v1133_v6 }
 0x638   : > { %v1135_v23 = vrot.slane %v1134_v7, 1 }
 0x63a   : > { %v1136_v8 = vmax.f32 %v1134_v7, %v1135_v23 }
 0x63c   : > { %v1137_v24 = vsub.f32 %v1129_v1, %v1136_v8 }
 0x63e   : > { %v1138_v9 = vmul.f32 1.442695, %v1137_v24 }
 0x640   : > { %1899 = vpow2.f32 %v1138_v9 }
 0x64a   : > { %v1900_v10 = vpop.eup %1899 }
 0x64b   : > { %v1140_v11 = vsel %vm375_vm1, %v1900_v10, 0.0 }
 0x64c   : > { %v1141_v12 = vrot.slane %v1140_v11, 4 }
 0x64e   : > { %v1142_v13 = vadd.f32 %v1141_v12, %v1140_v11 }
 0x650   : > { %v1143_v14 = vrot.slane %v1142_v13, 2 }
 0x652   : > { %v1144_v16 = vadd.f32 %v1143_v14, %v1142_v13 }
 0x654   : > { %v1145_v17 = vrot.slane %v1144_v16, 1 }
 0x656   : > { %v1146_v18 = vadd.f32 %v1145_v17, %v1144_v16 }
 0x658   : > { %1901 = vrcp.f32 %v1146_v18 }
 0x662   : > { %v1902_v19 = vpop.eup %1901 }
 0x663   : > { %v1148_v20 = vmul.f32 %v1902_v19, %v1900_v10 }
 0x665   : > { %v1149_v27 = vmul.f32 %v1898_v63, %v1148_v20 }
 0x667   : > { %1803 = vmatpush3.msra.mxu1 %v1149_v27 }
 0x668   : > { %1805 = vmatmul.mubr.msk.f32.vlgmr.msra.gmra.mrb[16].mxu1 %vm375_vm1, %v1166_v28 }
 0x669   : > { %1809 = vmatprep.mubr.msk.f32.mxu1 %vm375_vm1, %v2121_v22  ;;  %v1827_v22 = vpack.c.bf16 %v184_v33, %v183_v31 }
 0x66b   : > { %1828 = vmatpush3.bf16.msra.mxu0 %v1827_v22 }
 0x66c   : > { %1829 = vmatprep.subr.bf16.mxu0 %v1980_v34 }
 0x73b   : > { %v1251_v29 = vpop.f32.mrb[16].mxu1 }
 0x73c   : > { %v1255_v30 = vmul.f32 %v2163_v50, %v1251_v29  ;;  %v1806_v15 = vpop.f32.mrb[17].mxu1  ;;  %v1354_v50 = vsub.f32 0.0, %v2127_v25 }
 0x73e   : > { %1807 = vmatprep.subr.mxu1 %v1255_v30  ;;  %v1357_v36 = vmul.f32 1.442695, %v1354_v50 }
 0x73f   : > { %1808 = vmatpush3.msra.mxu1 %v1255_v30 }
 0x740   : > { %1810 = vmatmul.mubr.msk.f32.vlgmr.msra.gmra.mrb[18].mxu1 %vm375_vm1, %v2119_v21  ;;  %1903 = vpow2.f32 %v1357_v36 }
 0x741   : > { %1905 = vpow2.f32 %v1355_v37 }
 0x74a   : > { %v1904_v48 = vpop.eup %1903 }
 0x74b   : > { %v1906_v51 = vpop.eup %1905  ;;  %v1360_v53 = vadd.f32 1.0, %v1904_v48 }
 0x74c   : > { %v1359_v54 = vadd.f32 1.0, %v1906_v51 }
 0x74d   : > { %1907 = vrcp.f32 %v1360_v53 }
 0x74e   : > { %1909 = vrcp.f32 %v1359_v54 }
 0x757   : > { %v1908_v57 = vpop.eup %1907 }
 0x758   : > { %v1910_v58 = vpop.eup %1909  ;;  %v1364_v60 = vmul.f32 %v1908_v57, %v2127_v25  ;;  %v182_v25 = vld [vmem:[%s2291_s2 + $0x8] sm:$0xff] }
 0x759   : > { %v1363_v63 = vmul.f32 %v1910_v58, %v2129_v26  ;;  %v1830_v26 = vpack.c.bf16 %v182_v25, %v181_v4 }
 0x813   : > { %v1811_v21 = vpop.f32.mrb[18].mxu1 }
 0x814   : > { %v1338_v38 = vmul.f32 %v1811_v21, %v1811_v21  ;;  %v1328_v39 = vpop.f32.mrb[19].mxu1 }
 0x815   : > { %v1337_v40 = vmul.f32 %v1328_v39, %v1328_v39 }
 0x816   : > { %v1340_v41 = vsel %vm375_vm1, %v1338_v38, 0.0 }
 0x817   : > { %v1339_v42 = vsel %vm375_vm1, %v1337_v40, 0.0 }
 0x818   : > { %v1341_v43 = vadd.f32 %v1340_v41, %v1339_v42 }
 0x81a   : > { %v1342_v44 = vrot.slane %v1341_v43, 4 }
 0x81c   : > { %v1343_v45 = vadd.f32 %v1342_v44, %v1341_v43 }
 0x81e   : > { %v1344_v46 = vrot.slane %v1343_v45, 2 }
 0x820   : > { %v1345_v49 = vadd.f32 %v1344_v46, %v1343_v45 }
 0x822   : > { %v1346_v52 = vrot.slane %v1345_v49, 1 }
 0x824   : > { %v1347_v55 = vadd.f32 %v1346_v52, %v1345_v49 }
 0x826   : > { %v1348_v56 = vmul.f32 0.0625, %v1347_v55 }
 0x828   : > { %v1349_v47 = vadd.f32 1e-05, %v1348_v56 }
 0x82a   : > { %1911 = vrsqrt.f32 %v1349_v47 }
 0x834   : > { %v1912_v59 = vpop.eup %1911 }
 0x835   : > { %v1351_v0 = vmul.f32 %v1912_v59, %v1328_v39  ;;  %v1352_v1 = vmul.f32 %v1912_v59, %v1811_v21 }
 0x837   : > { %v1365_v2 = vmul.f32 %v1363_v63, %v1351_v0  ;;  %v1366_v3 = vmul.f32 %v1364_v60, %v1352_v1 }
 0x839   : > { %1367 = vxpose.xlu0.b32.start [1/2] (short) (narrow) %v1365_v2, 8 }
 0x83d   : > { %1368 = vxpose.xlu0.b32.end [2/2] (short) (narrow) %v1366_v3, 8 }
 0x841   : > { %1473 = vxpose.xlu0.b32.start [1/2] (short) (narrow) %v2207_v61, 8 }
 0x845   : > { %1474 = vxpose.xlu0.b32.end [2/2] (short) (narrow) %v2209_v62, 8 }
 0x8b9   : > { %v1383_v5 = vpop.trf.xlu0 }
 0x8ba   : > { %1817 = vmatmul.mubr.msk.f32.vlgmr.msra.gmra.mrb[14].mxu0 %vm1399_vm4, %v1383_v5 }
 0x8bb   : > { %1831 = vmatpush3.bf16.msra.mxu0 %v1830_v26  ;;  %1823 = vmatprep.mubr.msk.f32.mxu0 %vm1978_vm2, %v1977_v32 }
 0x8c1   : > { %v1489_v61 = vpop.trf.xlu0 }
 0x8c2   : > { %1824 = vmatmul.mubr.msk.f32.vlgmr.msra.gmra.mrb[14].mxu0 %vm1399_vm4, %v1489_v61 }
 0x995   : > { %v1574_v62 = vpop.f32.mrb[14].mxu0 }
 0x996   : > { %1578 = vst.msk [vmem:[%s161_s5] sm:$0xff] %vm185_vm0, %v1574_v62  ;;  %v1825_v32 = vpop.f32.mrb[15].mxu0 }
 0x997   : > { %1926 = shalt.err (!%p1923_p3)
}
 0x998   : > { %s1927_s20 = scalar_lea.hbm %s2246_s9, 128  ;;  %s1931_s26 = scalar_lea.hbm %s2292_s3, 256 }
 0x999   : > { %p1928_p4 = scmp.ne.s32.totalorder %s2246_s9, %s1927_s20  ;;  %p1932_p9 = scmp.lt.u32.totalorder %s2246_s9, %s2292_s3 }
 0x99a   : > { %p1933_p10 = scmp.lt.u32.totalorder %s1931_s26, %s1927_s20  ;;  %p1935_p12 = scmp.lt.u32.totalorder %s1927_s20, %s2246_s9 }
 0x99b   : > { %p1929_p7 = pnand %p1928_p4, %p2040_p5 }
 0x99c   : > { %p1934_p11 = por %p1933_p10, %p1932_p9 }
 0x99d   : > { %p1930_p8 = pneg %p1929_p7 }
 0x99e   : > { %p1936_p13 = por %p1935_p12, %p1934_p11 }
 0x9a0   : > { %p1937_p0 = pnand %p1936_p13, %p1930_p8 }
 0x9a2   : > { %1940 = shalt.err (!%p1937_p0)
}
 0x9a3   : > { %1834 = dma.vmem_to_hbm [thread:$0]  (%p2040_p5), %s2248_s6, 128, %s2246_s9, %s1580_s10  }
 0x9a4 PF: > { %p1840_p1 = scmp.ge.s32.totalorder %s1975_s15, 2  ;;  %s1605_s29 = sand.u32 1, %s1963_s12  }
 0x9a5   : > { %s1606_s30 = scalar_lea.sflag [#allocation3], %s1605_s29 }
 0x9a6   : > { %p1837_p2 = pnand %p1840_p1, %p2044_p6 }
 0x9a8   : > { %1958 = dma.done.wait (!%p1837_p2), %s1606_s30, 128  }
 0x9a9   : > { %1960 = vsyncadd (!%p1837_p2), %s1606_s30, 4294967168  ;;  %p13_p3 = scmp.ge.s32.totalorder %s2027_s18, 4   ;;  %s2295_s12 = smov %s1967_s13 }
 0x9aa   : > { %s2296_s13 = smov %s1971_s14  ;;  %s2297_s14 = smov %s2038_s21 }
 0x9ab   : > { %s2298_s15 = smov %s2027_s18  ;;  %15 = sbr.rel (!%p13_p3) target bundleno = 3 (0x3), region = 67 }
 0x9b2   :  { %1611 = vsyncpa [#allocation3], 1 }
 0x9b3   :  { %1613 = vsyncpa [#allocation3 + $0x1], 1 }

</bundles_post_ra>
